<compile_context>
chip_gen: v6e
topology: v6e:2x2x1
jax: 0.10.0
libtpu: 0.0.40
codegen_flags: <defaults>
</compile_context>

<pallas_src>
import jax
import jax.numpy as jnp
from jax.experimental import pallas as pl
from jax.experimental.pallas import tpu as pltpu

# Small, TPU-friendly shapes consistent with the module (scaled down from
# n_embd=384, block_size=256; head_size is a free constructor argument).
N_EMBD = 128
HEAD_SIZE = 128
SEQ_LEN = 128
BATCH = 2
NEG_INF = -1e30  # large finite negative (NaN-safe under padding)


def _head_kernel(x_ref, wqkv_ref, o_ref):
    # x_ref:   (1, T, C)  bf16  (one batch element per grid step)
    # wqkv_ref:(C, 3*HS)  bf16  (q-scale already folded into the first HS cols)
    # o_ref:   (1, T, HS) f32
    _, T, C = x_ref.shape
    HS = wqkv_ref.shape[-1] // 3

    # ---- Fused QKV projection for this batch element (single MXU pass) ----
    x2d = x_ref[0]                                              # (T, C) bf16
    qkv = jnp.dot(x2d, wqkv_ref[...],
                  preferred_element_type=jnp.float32)           # (T, 3*HS) f32

    q = qkv[:, 0 * HS:1 * HS].astype(jnp.bfloat16)              # scale pre-folded
    k = qkv[:, 1 * HS:2 * HS].astype(jnp.bfloat16)
    v = qkv[:, 2 * HS:3 * HS].astype(jnp.bfloat16)

    # ---- Scores + additive causal bias + numerically stable softmax (f32) ----
    scores = jnp.dot(q, k.T, preferred_element_type=jnp.float32)  # (T, T)
    rows = jax.lax.broadcasted_iota(jnp.int32, (T, T), 0)
    cols = jax.lax.broadcasted_iota(jnp.int32, (T, T), 1)
    bias = jnp.where(rows >= cols, 0.0, NEG_INF).astype(jnp.float32)
    scores = scores + bias

    m = jnp.max(scores, axis=-1, keepdims=True)
    p = jnp.exp(scores - m)
    denom = jnp.sum(p, axis=-1, keepdims=True)
    wei = p * pl.reciprocal(denom, approx=True)

    # ---- Attention-weighted values (dropout on `wei` is identity in eval) ----
    out = jnp.dot(wei.astype(jnp.bfloat16), v,
                  preferred_element_type=jnp.float32)           # (T, HS)
    o_ref[0] = out.astype(o_ref.dtype)


def fuse_head_params(wq, wk, wv):
    """One-time parameter prep: fold 1/sqrt(HS) into wq, fuse to (C, 3*HS) bf16.

    Weights are stored as (in, out) so y = x @ W, matching nn.Linear(x) = x W^T
    with W^T supplied here.
    """
    HS = wq.shape[1]
    wq_scaled = wq * (float(HS) ** -0.5)
    return jnp.concatenate([wq_scaled, wk, wv], axis=1).astype(jnp.bfloat16)


@jax.jit
def head_attention(x, wqkv):
    """x: (B, T, C) f32; wqkv: (C, 3*HS) bf16 from fuse_head_params."""
    B, T, C = x.shape
    HS = wqkv.shape[1] // 3
    x_bf16 = x.astype(jnp.bfloat16)  # halve the x DMA bytes into the kernel

    return pl.pallas_call(
        _head_kernel,
        out_shape=jax.ShapeDtypeStruct((B, T, HS), x.dtype),
        grid=(B,),
        in_specs=[
            pl.BlockSpec((1, T, C), lambda b: (b, 0, 0)),
            pl.BlockSpec((C, 3 * HS), lambda b: (0, 0)),  # resident across steps
        ],
        out_specs=pl.BlockSpec((1, T, HS), lambda b: (b, 0, 0)),
        compiler_params=pltpu.CompilerParams(
            dimension_semantics=("parallel",)),  # 2 TCs on v7x; neutral on v5e/v6e
    )(x_bf16, wqkv)


def head_reference(x, wq, wk, wv):
    """Pure-JAX reference mirroring Head.forward (eval-mode dropout), using the
    same bf16-operand / f32-accumulation precision as the kernel."""
    B, T, C = x.shape
    HS = wq.shape[1]
    xb = x.astype(jnp.bfloat16)
    q = jnp.dot(xb, wq.astype(jnp.bfloat16), preferred_element_type=jnp.float32)
    k = jnp.dot(xb, wk.astype(jnp.bfloat16), preferred_element_type=jnp.float32)
    v = jnp.dot(xb, wv.astype(jnp.bfloat16), preferred_element_type=jnp.float32)
    wei = jnp.einsum("bqd,bkd->bqk",
                     (q * float(HS) ** -0.5).astype(jnp.bfloat16),
                     k.astype(jnp.bfloat16),
                     preferred_element_type=jnp.float32)
    mask = jnp.tril(jnp.ones((T, T), bool))
    wei = jnp.where(mask[None, :, :], wei, -jnp.inf)
    wei = jax.nn.softmax(wei, axis=-1)
    out = jnp.einsum("bqk,bkd->bqd", wei.astype(jnp.bfloat16),
                     v.astype(jnp.bfloat16),
                     preferred_element_type=jnp.float32)
    return out.astype(x.dtype)


if __name__ == "__main__":
    key = jax.random.PRNGKey(0)
    kx, kq, kk, kv = jax.random.split(key, 4)
    x = jax.random.normal(kx, (BATCH, SEQ_LEN, N_EMBD), jnp.float32)
    s = N_EMBD ** -0.5
    wq = jax.random.normal(kq, (N_EMBD, HEAD_SIZE), jnp.float32) * s
    wk = jax.random.normal(kk, (N_EMBD, HEAD_SIZE), jnp.float32) * s
    wv = jax.random.normal(kv, (N_EMBD, HEAD_SIZE), jnp.float32) * s

    # One-time parameter preparation (scale fold + QKV fusion + bf16 cast).
    wqkv = jax.block_until_ready(fuse_head_params(wq, wk, wv))

    out = jax.block_until_ready(head_attention(x, wqkv))
    ref = jax.block_until_ready(head_reference(x, wq, wk, wv))

    assert out.shape == (BATCH, SEQ_LEN, HEAD_SIZE)
    max_err = float(jnp.max(jnp.abs(out - ref)))
    # Tolerance covers bf16 matmul operands, the one-time bf16 re-rounding of the
    # scaled wq, and the approximate EUP reciprocal (softmax math is f32);
    # semantic errors would be O(0.1+).
    assert jnp.allclose(out, ref, atol=2e-2, rtol=2e-2), max_err
    print("KERNEL_OK")
</pallas_src>

<mosaic_0001>
module attributes {stable_mosaic.version = 11 : i64} {
  func.func @_head_kernel(%arg0: i32, %arg1: memref<1x128x128xbf16, #tpu.memory_space<vmem>>, %arg2: memref<128x384xbf16, #tpu.memory_space<vmem>>, %arg3: memref<1x128x128xf32, #tpu.memory_space<vmem>>) attributes {dimension_semantics = [#tpu.dimension_semantics<parallel>], iteration_bounds = array<i64: 2>, scalar_prefetch = 0 : i64, scratch_operands = 0 : i64, tpu.core_type = #tpu.core_type<tc>, window_params = [{transform_indices = @transform_0, window_bounds = array<i64: 1, 128, 128>}, {pipeline_mode = #tpu.pipeline_mode<synchronous>, transform_indices = @transform_1, window_bounds = array<i64: 128, 384>}, {transform_indices = @transform_2, window_bounds = array<i64: 1, 128, 128>}]} {
    %c0 = arith.constant 0 : index
    %c0_0 = arith.constant 0 : index
    %c0_1 = arith.constant 0 : index
    %0 = vector.load %arg1[%c0, %c0_0, %c0_1] : memref<1x128x128xbf16, #tpu.memory_space<vmem>>, vector<1x128x128xbf16>
    %1 = vector.shape_cast %0 : vector<1x128x128xbf16> to vector<128x128xbf16>
    %c0_2 = arith.constant 0 : index
    %c0_3 = arith.constant 0 : index
    %2 = vector.load %arg2[%c0_2, %c0_3] : memref<128x384xbf16, #tpu.memory_space<vmem>>, vector<128x384xbf16>
    %cst = arith.constant dense<0.000000e+00> : vector<128x384xf32>
    %3 = tpu.matmul %1, %2, %cst {dimension_numbers = #tpu.dot_dimension_numbers<[1], [0], [0], [1], [0, 0, 1, 1], [], []>} : vector<128x128xbf16>, vector<128x384xbf16>, vector<128x384xf32> -> vector<128x384xf32>
    %4 = vector.extract_strided_slice %3 {offsets = [0, 0], sizes = [128, 128], strides = [1, 1]} : vector<128x384xf32> to vector<128x128xf32>
    %5 = arith.truncf %4 : vector<128x128xf32> to vector<128x128xbf16>
    %6 = vector.extract_strided_slice %3 {offsets = [0, 128], sizes = [128, 128], strides = [1, 1]} : vector<128x384xf32> to vector<128x128xf32>
    %7 = arith.truncf %6 : vector<128x128xf32> to vector<128x128xbf16>
    %8 = vector.extract_strided_slice %3 {offsets = [0, 256], sizes = [128, 128], strides = [1, 1]} : vector<128x384xf32> to vector<128x128xf32>
    %9 = arith.truncf %8 : vector<128x128xf32> to vector<128x128xbf16>
    %10 = tpu.transpose %7, [1, 0] : vector<128x128xbf16> -> vector<128x128xbf16>
    %cst_4 = arith.constant dense<0.000000e+00> : vector<128x128xf32>
    %11 = tpu.matmul %5, %10, %cst_4 {dimension_numbers = #tpu.dot_dimension_numbers<[1], [0], [0], [1], [0, 0, 1, 1], [], []>} : vector<128x128xbf16>, vector<128x128xbf16>, vector<128x128xf32> -> vector<128x128xf32>
    %12 = tpu.iota {dimensions = array<i32: 0>} : vector<128x128xi32>
    %13 = tpu.iota {dimensions = array<i32: 1>} : vector<128x128xi32>
    %14 = arith.cmpi sge, %12, %13 : vector<128x128xi32>
    %cst_5 = arith.constant 0.000000e+00 : f32
    %cst_6 = arith.constant -1.000000e+30 : f32
    %15 = vector.broadcast %cst_5 : f32 to vector<128x128xf32>
    %16 = vector.broadcast %cst_6 : f32 to vector<128x128xf32>
    %17 = arith.select %14, %15, %16 : vector<128x128xi1>, vector<128x128xf32>
    %18 = arith.addf %11, %17 : vector<128x128xf32>
    %cst_7 = arith.constant dense<0xFF800000> : vector<128xf32>
    %19 = vector.multi_reduction <maximumf>, %18, %cst_7 [1] : vector<128x128xf32> to vector<128xf32>
    %20 = vector.shape_cast %19 : vector<128xf32> to vector<128x1xf32>
    %21 = vector.broadcast %20 : vector<128x1xf32> to vector<128x128xf32>
    %22 = arith.subf %18, %21 : vector<128x128xf32>
    %23 = math.exp %22 : vector<128x128xf32>
    %cst_8 = arith.constant dense<0.000000e+00> : vector<128xf32>
    %24 = vector.multi_reduction <add>, %23, %cst_8 [1] : vector<128x128xf32> to vector<128xf32>
    %25 = vector.shape_cast %24 : vector<128xf32> to vector<128x1xf32>
    %26 = tpu.reciprocal %25 {approx = true} : vector<128x1xf32> -> vector<128x1xf32>
    %27 = vector.broadcast %26 : vector<128x1xf32> to vector<128x128xf32>
    %28 = arith.mulf %23, %27 : vector<128x128xf32>
    %29 = arith.truncf %28 : vector<128x128xf32> to vector<128x128xbf16>
    %cst_9 = arith.constant dense<0.000000e+00> : vector<128x128xf32>
    %30 = tpu.matmul %29, %9, %cst_9 {dimension_numbers = #tpu.dot_dimension_numbers<[1], [0], [0], [1], [0, 0, 1, 1], [], []>} : vector<128x128xbf16>, vector<128x128xbf16>, vector<128x128xf32> -> vector<128x128xf32>
    %c0_10 = arith.constant 0 : index
    %c0_11 = arith.constant 0 : index
    %c0_12 = arith.constant 0 : index
    %31 = vector.load %arg3[%c0_10, %c0_11, %c0_12] : memref<1x128x128xf32, #tpu.memory_space<vmem>>, vector<1x128x128xf32>
    %32 = vector.shape_cast %31 : vector<1x128x128xf32> to vector<128x128xf32>
    %33 = vector.shape_cast %30 : vector<128x128xf32> to vector<1x128x128xf32>
    tpu.vector_store %arg3[%c0_10, %c0_11, %c0_12], %33 {strides = array<i32>} : memref<1x128x128xf32, #tpu.memory_space<vmem>>, vector<1x128x128xf32>,
    return
  }
  func.func @transform_0(%arg0: i32) -> (i32, i32, i32) {
    %c0_i32 = arith.constant 0 : i32
    %c0_i32_0 = arith.constant 0 : i32
    %c0_i32_1 = arith.constant 0 : i32
    return %arg0, %c0_i32, %c0_i32_0 : i32, i32, i32
  }
  func.func @transform_1(%arg0: i32) -> (i32, i32) {
    %c0_i32 = arith.constant 0 : i32
    %c0_i32_0 = arith.constant 0 : i32
    %c0_i32_1 = arith.constant 0 : i32
    return %c0_i32, %c0_i32_0 : i32, i32
  }
  func.func @transform_2(%arg0: i32) -> (i32, i32, i32) {
    %c0_i32 = arith.constant 0 : i32
    %c0_i32_0 = arith.constant 0 : i32
    %c0_i32_1 = arith.constant 0 : i32
    return %arg0, %c0_i32, %c0_i32_0 : i32, i32, i32
  }
}

</mosaic_0001>

<bundles_post_ra>
// kernel: head_attention.1
= control target key start
LH: loop header
LB: loop body
LE: loop exit
PB: predicated region body
PF: predicated region fallthrough
CT: control target
= control target key end

     0   :  { %7 = vsyncpa [#allocation3], 0  ;;  %s1953_s0 = inlined_call_operand.vmem [shape: bf16[2,128,128], index: 0, kind: input, shape index: {}]   ;;  %s1954_s1 = inlined_call_operand.vmem [shape: bf16[128,384], index: 1, kind: input, shape index: {}]   ;;  %s1955_s2 = inlined_call_operand.hbm [shape: f32[2,128,128], index: 2, kind: output, shape index: {}]  }
   0x1   :  { %9 = vsyncpa [#allocation3 + $0x1], 0  ;;  %s1509_s9 = smov 0   ;;  %s1511_s10 = smov 0  }
   0x2   :  { %s1513_s11 = smov 0   ;;  %s1515_s12 = smov 0  }
   0x3 LB: > { %s1530_s13 = sadd.s32 4294967295, %s1487_s12   ;;  %s1090_s14 = sadd.s32 4294967294, %s1487_s12   ;;  %s1487_s12 = sphi %s1515_s12, %s1961_s12   ;;  %s1483_s11 = sphi %s1513_s11, %s1960_s11   ;;  %s1479_s10 = sphi %s1511_s10, %s1959_s10   ;;  %s1475_s9 = sphi %s1509_s9, %s1958_s9  }
   0x4   : > { %s1534_s15 = sadd.s32 1, %s1487_s12   ;;  %s69_s16 = sadd.s32 1, %s1483_s11 }
   0x5   : > { %s66_s17 = ssub.s32 %s1487_s12, %s1534_s15  ;;  %p79_p0 = scmp.ne.s32.totalorder %s1483_s11, %s1479_s10 }
   0x6   : > { %p67_p1 = scmp.eq.s32.totalorder %s66_s17, 0  ;;  %p80_p2 = scmp.eq.s32.totalorder %s1530_s13, 1 }
   0x7   : > { %p85_p3 = scmp.ne.s32.totalorder %s1479_s10, %s1475_s9  ;;  %p86_p4 = scmp.eq.s32.totalorder %s1090_s14, 1 }
   0x8   : > { %s1545_s18 = scalar_select %p67_p1, %s1483_s11, %s69_s16  }
   0x9   : > { %p1547_p5 = por %p80_p2, %p79_p0  ;;  %p1551_p6 = por %p86_p4, %p85_p3 }
   0xa   : > { %p1093_p7 = scmp.ge.s32.totalorder %s1487_s12, 1  ;;  %p115_p8 = scmp.lt.s32.totalorder %s1487_s12, 3 }
   0xc   : > { %p116_p9 = pnand %p1093_p7, %p115_p8 }
   0xd   : > { %p137_p10 = scmp.lt.s32.totalorder (!%p116_p9), %s1530_s13, 1  ;;  %s134_s8 = sand.u32 (!%p116_p9), 1, %s1479_s10  }
   0xe   : > { %119 = sbr.rel (%p116_p9) target bundleno = 1127 (0x467), region = 28  ;;  %s1094_s14 = sshll.u32 (!%p116_p9), %s134_s8, 7 }
   0xf   : > { %s1884_s16 = scalar_lea.vmem (!%p116_p9), [#allocation2], %s1094_s14  ;;  %s1913_s25 = scalar_lea.sflag (!%p116_p9), [#allocation3], %s134_s8 }
  0x10   : > { %s1028_s21 = sshll.u32 (!%p116_p9), %s1884_s16, 4  ;;  %s1491_s26 = smov (!%p116_p9), [#allocation2]   ;;  %s1907_s21 = int_to_ptr.vmem [resolvable:$true] %s1028_s21 }
  0x13   : > { %v1323_v0 = vld [vmem:[%s1954_s1 + $0xac] ss:$12 sps:$4 sm:$0xff]   ;;  %v1325_v1 = vld [vmem:[%s1954_s1 + $0xa8] ss:$12 sps:$4 sm:$0xff]   ;;  %v1489_v2 = vmov 0   ;;  %s138_s27 = scalar_select %p137_p10, %s1530_s13, 1 }
  0x14   : > { %399 = vmatprep.mubr.bf16.mxu0 %v1489_v2  ;;  %367 = vmatprep.subr.bf16.mxu0 %v1323_v0  ;;  %v1326_v3 = vld [vmem:[%s1954_s1 + $0x94] ss:$12 sps:$4 sm:$0xff]   ;;  %v1328_v4 = vld [vmem:[%s1954_s1 + $0x90] ss:$12 sps:$4 sm:$0xff]   ;;  %v1331_v6 = vld [vmem:[%s1954_s1 + $0x78] ss:$12 sps:$4 sm:$0xff]  }
  0x15   : > { %368 = vmatpush1.bf16.msra.mxu0 %v1325_v1  ;;  %v1329_v5 = vld [vmem:[%s1954_s1 + $0x7c] ss:$12 sps:$4 sm:$0xff]   ;;  %s1134_s4 = sshll.u32 %s138_s27, 6  ;;  %v1332_v7 = vld [vmem:[%s1954_s1 + $0x64] ss:$12 sps:$4 sm:$0xff]   ;;  %s1431_s27 = sshll.u32 %s1491_s26, 4  ;;  %s1432_s27 = int_to_ptr.vmem [resolvable:$false] %s1431_s27 }
  0x16   : > { %369 = vmatprep.subr.bf16.mxu0 %v1326_v3  ;;  %s1583_s17 = scalar_lea.vmem %s1953_s0, %s1134_s4  ;;  %v1334_v8 = vld [vmem:[%s1954_s1 + $0x60] ss:$12 sps:$4 sm:$0xff]   ;;  %v1337_v11 = vld [vmem:[%s1954_s1 + $0x48] ss:$12 sps:$4 sm:$0xff]   ;;  %v1340_v13 = vld [vmem:[%s1954_s1 + $0x30] ss:$12 sps:$4 sm:$0xff]   ;;  %p1434_p0 = scmp.lt.s32.totalorder %s1907_s21, %s1432_s27 }
  0x17   : > { %v1347_v9 = vld [vmem:[%s1583_s17] sm:$0xff]   ;;  %v1335_v10 = vld [vmem:[%s1954_s1 + $0x4c] ss:$12 sps:$4 sm:$0xff]   ;;  %v1341_v14 = vld [vmem:[%s1954_s1 + $0x1c] ss:$12 sps:$4 sm:$0xff]   ;;  %s1433_s28 = scalar_lea.vmem %s1432_s27, 4096 }
  0x18   : > { %1200 = vmatprep.mubr.bf16.mxu1 %v1347_v9  ;;  %v1338_v12 = vld [vmem:[%s1954_s1 + $0x34] ss:$12 sps:$4 sm:$0xff]   ;;  %v1343_v15 = vld [vmem:[%s1954_s1 + $0x18] ss:$12 sps:$4 sm:$0xff]   ;;  %v1614_v18 = vld [vmem:[%s1583_s17 + $0x8] sm:$0xff]  }
  0x19   : > { %370 = vmatpush1.bf16.msra.mxu0 %v1328_v4  ;;  %v1344_v16 = vld [vmem:[%s1954_s1 + $0x4] ss:$12 sps:$4 sm:$0xff]   ;;  %v1346_v17 = vld [vmem:[%s1954_s1] ss:$12 sps:$4 sm:$0xff]   ;;  %v1622_v20 = vld [vmem:[%s1583_s17 + $0x18] sm:$0xff]  }
  0x1a   : > { %371 = vmatprep.subr.bf16.mxu0 %v1329_v5  ;;  %v1618_v19 = vld [vmem:[%s1583_s17 + $0x10] sm:$0xff]   ;;  %v1626_v21 = vld [vmem:[%s1583_s17 + $0x20] sm:$0xff]   ;;  %v1630_v22 = vld [vmem:[%s1583_s17 + $0x28] sm:$0xff]  }
  0x1b   : > { %v1634_v23 = vld [vmem:[%s1583_s17 + $0x30] sm:$0xff]   ;;  %v1638_v24 = vld [vmem:[%s1583_s17 + $0x38] sm:$0xff]   ;;  %v1357_v49 = vld [vmem:[%s1954_s1 + $0x80] ss:$12 sps:$4 sm:$0xff]   ;;  %s1135_s17 = sshll.u32 %s1530_s13, 11  ;;  %s1427_s13 = scalar_lea.vmem %s1907_s21, 2048 }
  0x1c   : > { %v1355_v44 = vld [vmem:[%s1954_s1 + $0xb0] ss:$12 sps:$4 sm:$0xff]   ;;  %v1356_v45 = vld [vmem:[%s1954_s1 + $0x98] ss:$12 sps:$4 sm:$0xff]   ;;  %v1358_v52 = vld [vmem:[%s1954_s1 + $0x68] ss:$12 sps:$4 sm:$0xff]   ;;  %s1905_s24 = scalar_lea.hbm %s1955_s2, %s1135_s17  ;;  %p1428_p11 = scmp.ne.s32.totalorder %s1907_s21, %s1427_s13 }
  0x1d   : > { %372 = vmatpush1.bf16.msra.mxu0 %v1331_v6  ;;  %1184 = vmatprep.subr.bf16.mxu1 %v1355_v44  ;;  %v1359_v56 = vld [vmem:[%s1954_s1 + $0x50] ss:$12 sps:$4 sm:$0xff]   ;;  %p1435_p1 = scmp.lt.s32.totalorder %s1433_s28, %s1427_s13 }
  0x1e   : > { %373 = vmatprep.subr.bf16.mxu0 %v1332_v7  ;;  %1185 = vmatpush3.bf16.msra.mxu1 %v1355_v44  ;;  %p1429_p12 = pnand %p1428_p11, %p1547_p5 }
  0x1f   : > { %1186 = vmatprep.subr.bf16.mxu1 %v1356_v45  ;;  %p1436_p2 = por %p1435_p1, %p1434_p0 }
  0x20   : > { %p1430_p13 = pneg %p1429_p12 }
  0x21   : > { %374 = vmatpush1.bf16.msra.mxu0 %v1334_v8 }
  0x22   : > { %375 = vmatprep.subr.bf16.mxu0 %v1335_v10  ;;  %1187 = vmatpush3.bf16.msra.mxu1 %v1356_v45  ;;  %p1437_p3 = pnand %p1436_p2, %p1430_p13 }
  0x23   : > { %1188 = vmatprep.subr.bf16.mxu1 %v1357_v49 }
  0x25   : > { %376 = vmatpush1.bf16.msra.mxu0 %v1337_v11 }
  0x26   : > { %377 = vmatprep.subr.bf16.mxu0 %v1338_v12  ;;  %1189 = vmatpush3.bf16.msra.mxu1 %v1357_v49 }
  0x27   : > { %1190 = vmatprep.subr.bf16.mxu1 %v1358_v52 }
  0x29   : > { %378 = vmatpush1.bf16.msra.mxu0 %v1340_v13 }
  0x2a   : > { %379 = vmatprep.subr.bf16.mxu0 %v1341_v14  ;;  %1191 = vmatpush3.bf16.msra.mxu1 %v1358_v52  ;;  %v1360_v14 = vld [vmem:[%s1954_s1 + $0x38] ss:$12 sps:$4 sm:$0xff]  }
  0x2b   : > { %1192 = vmatprep.subr.bf16.mxu1 %v1359_v56 }
  0x2d   : > { %380 = vmatpush1.bf16.msra.mxu0 %v1343_v15  ;;  %v1361_v15 = vld [vmem:[%s1954_s1 + $0x20] ss:$12 sps:$4 sm:$0xff]  }
  0x2e   : > { %381 = vmatprep.subr.bf16.mxu0 %v1344_v16  ;;  %1193 = vmatpush3.bf16.msra.mxu1 %v1359_v56  ;;  %v1362_v16 = vld [vmem:[%s1954_s1 + $0x8] ss:$12 sps:$4 sm:$0xff]  }
  0x2f   : > { %1194 = vmatprep.subr.bf16.mxu1 %v1360_v14 }
  0x31   : > { %382 = vmatpush1.bf16.msra.mxu0 %v1346_v17  ;;  %v601_v17 = vlaneseq }
  0x32   : > { %1195 = vmatpush3.bf16.msra.mxu1 %v1360_v14 }
  0x33   : > { %1196 = vmatprep.subr.bf16.mxu1 %v1361_v15 }
  0x34   : > { %400 = vmatmul.mubr.bf16.vlgmr.msra.gmra.mxu0 %v1347_v9 }
  0x35   : > { %409 = vmatprep.mubr.bf16.mxu0 %v1489_v2 }
  0x36   : > { %1197 = vmatpush3.bf16.msra.mxu1 %v1361_v15 }
  0x37   : > { %1198 = vmatprep.subr.bf16.mxu1 %v1362_v16 }
  0x3a   : > { %1199 = vmatpush3.bf16.msra.mxu1 %v1362_v16 }
  0x3c   : > { %410 = vmatmul.mubr.bf16.gmra.mxu0 %v1614_v18 }
  0x3d   : > { %419 = vmatprep.mubr.bf16.mxu0 %v1489_v2  ;;  %1201 = vmatmul.mubr.bf16.vlgmr.msra.gmra.mxu1 %v1614_v18 }
  0x3e   : > { %1204 = vmatprep.mubr.bf16.mxu1 %v1618_v19 }
  0x44   : > { %420 = vmatmul.mubr.bf16.gmra.mxu0 %v1618_v19 }
  0x45   : > { %429 = vmatprep.mubr.bf16.mxu0 %v1489_v2  ;;  %1205 = vmatmul.mubr.bf16.gmra.mxu1 %v1622_v20 }
  0x46   : > { %1208 = vmatprep.mubr.bf16.mxu1 %v1626_v21 }
  0x4c   : > { %430 = vmatmul.mubr.bf16.gmra.mxu0 %v1622_v20  ;;  %v1490_v20 = vmov -1e+30  }
  0x4d   : > { %439 = vmatprep.mubr.bf16.mxu0 %v1489_v2  ;;  %1209 = vmatmul.mubr.bf16.gmra.mxu1 %v1630_v22 }
  0x4e   : > { %1212 = vmatprep.mubr.bf16.mxu1 %v1634_v23 }
  0x54   : > { %440 = vmatmul.mubr.bf16.gmra.mxu0 %v1626_v21 }
  0x55   : > { %449 = vmatprep.mubr.bf16.mxu0 %v1489_v2  ;;  %1213 = vmatmul.mubr.bf16.gmra.mxu1 %v1638_v24 }
  0x5c   : > { %450 = vmatmul.mubr.bf16.gmra.mxu0 %v1630_v22 }
  0x5d   : > { %459 = vmatprep.mubr.bf16.mxu0 %v1489_v2 }
  0x64   : > { %460 = vmatmul.mubr.bf16.gmra.mxu0 %v1634_v23 }
  0x65   : > { %469 = vmatprep.mubr.bf16.mxu0 %v1489_v2 }
  0x6c   : > { %470 = vmatmul.mubr.bf16.gmra.mxu0 %v1638_v24 }
  0xf4   : > { %v401_v25 = vpop.f32.mrf.mxu0 }
  0xf6   : > { %v403_v26 = vpop.f32.mrf.mxu0 }
  0xf8   : > { %v405_v27 = vpop.f32.mrf.mxu0 }
  0xf9   : > { %v577_v28 = vpack.c.bf16 %v405_v27, %v401_v25  ;;  %v1701_v25 = vshrl.u32 %v601_v17, 7  ;;  %v1704_v27 = vand.u32 127, %v601_v17 }
  0xfa   : > { %v407_v29 = vpop.f32.mrf.mxu0 }
  0xfb   : > { %v1641_v30 = vpack.c.bf16 %v407_v29, %v403_v26  ;;  %1232 = vmatprep.mubr.bf16.mxu0 %v577_v28  ;;  %v604_v26 = vadd.s32 16, %v1701_v25  ;;  %v605_v18 = vadd.s32 24, %v1701_v25  ;;  %vm620_vm1 = vcmp.ge.s32.totalorder %v1701_v25, %v1704_v27 }
  0xfc   : > { %v1643_v31 = vpop.f32.mrf.mxu0  ;;  %v603_v19 = vadd.s32 8, %v1701_v25  ;;  %v636_v23 = vsel %vm620_vm1, 0.0, %v1490_v20  ;;  %v606_v28 = vadd.s32 32, %v1701_v25  ;;  %v611_v49 = vadd.s32 72, %v1701_v25 }
  0xfd   : > { %vm622_vm0 = vcmp.ge.s32.totalorder %v604_v26, %v1704_v27  ;;  %vm623_vm2 = vcmp.ge.s32.totalorder %v605_v18, %v1704_v27  ;;  %v613_v56 = vadd.s32 88, %v1701_v25 }
  0xfe   : > { %v413_v32 = vpop.f32.mrf.mxu0  ;;  %v638_v21 = vsel %vm622_vm0, 0.0, %v1490_v20  ;;  %vm621_vm3 = vcmp.ge.s32.totalorder %v603_v19, %v1704_v27  ;;  %vm624_vm4 = vcmp.ge.s32.totalorder %v606_v28, %v1704_v27  ;;  %vm629_vm10 = vcmp.ge.s32.totalorder %v611_v49, %v1704_v27 }
  0xff   : > { %vm631_vm11 = vcmp.ge.s32.totalorder %v613_v56, %v1704_v27 }
 0x100   : > { %v1645_v33 = vpop.f32.mrf.mxu0 }
 0x101   : > { %v578_v34 = vpack.c.bf16 %v1645_v33, %v1643_v31  ;;  %v637_v33 = vsel %vm621_vm3, 0.0, %v1490_v20 }
 0x102   : > { %v417_v35 = vpop.f32.mrf.mxu0 }
 0x103   : > { %v1649_v36 = vpack.c.bf16 %v417_v35, %v413_v32  ;;  %v608_v35 = vadd.s32 48, %v1701_v25 }
 0x104   : > { %v1651_v37 = vpop.f32.mrf.mxu0 }
 0x105   : > { %vm626_vm5 = vcmp.ge.s32.totalorder %v608_v35, %v1704_v27 }
 0x106   : > { %v423_v38 = vpop.f32.mrf.mxu0  ;;  %v642_v45 = vsel %vm626_vm5, 0.0, %v1490_v20 }
 0x108   : > { %v1653_v39 = vpop.f32.mrf.mxu0 }
 0x109   : > { %v579_v40 = vpack.c.bf16 %v1653_v39, %v1651_v37 }
 0x10a   : > { %v427_v41 = vpop.f32.mrf.mxu0 }
 0x10b   : > { %v587_v42 = vpack.c.bf16 %v427_v41, %v423_v38  ;;  %v609_v41 = vadd.s32 56, %v1701_v25 }
 0x10c   : > { %v1657_v43 = vpop.f32.mrf.mxu0 }
 0x10d   : > { %vm627_vm7 = vcmp.ge.s32.totalorder %v609_v41, %v1704_v27 }
 0x10e   : > { %v433_v46 = vpop.f32.mrf.mxu0 }
 0x110   : > { %v435_v47 = vpop.f32.mrf.mxu0 }
 0x111   : > { %v580_v48 = vpack.c.bf16 %v435_v47, %v1657_v43 }
 0x112   : > { %v437_v50 = vpop.f32.mrf.mxu0 }
 0x113   : > { %v588_v13 = vpack.c.bf16 %v437_v50, %v433_v46 }
 0x114   : > { %v441_v51 = vpop.f32.mrf.mxu0 }
 0x116   : > { %v443_v53 = vpop.f32.mrf.mxu0 }
 0x118   : > { %v445_v54 = vpop.f32.mrf.mxu0 }
 0x119   : > { %v581_v55 = vpack.c.bf16 %v445_v54, %v441_v51 }
 0x11a   : > { %v447_v57 = vpop.f32.mrf.mxu0 }
 0x11b   : > { %v589_v12 = vpack.c.bf16 %v447_v57, %v443_v53  ;;  %v643_v53 = vsel %vm627_vm7, 0.0, %v1490_v20  ;;  %v614_v57 = vadd.s32 96, %v1701_v25 }
 0x11c   : > { %v451_v58 = vpop.f32.mrf.mxu0 }
 0x11d   : > { %vm632_vm12 = vcmp.ge.s32.totalorder %v614_v57, %v1704_v27 }
 0x11e   : > { %v453_v59 = vpop.f32.mrf.mxu0 }
 0x120   : > { %v455_v60 = vpop.f32.mrf.mxu0 }
 0x121   : > { %v582_v61 = vpack.c.bf16 %v455_v60, %v451_v58 }
 0x122   : > { %v457_v62 = vpop.f32.mrf.mxu0 }
 0x123   : > { %v590_v11 = vpack.c.bf16 %v457_v62, %v453_v59 }
 0x124   : > { %v461_v63 = vpop.f32.mrf.mxu0 }
 0x126   : > { %v463_v0 = vpop.f32.mrf.mxu0 }
 0x128   : > { %v465_v1 = vpop.f32.mrf.mxu0 }
 0x129   : > { %v583_v2 = vpack.c.bf16 %v465_v1, %v461_v63  ;;  %v645_v63 = vsel %vm629_vm10, 0.0, %v1490_v20  ;;  %v615_v1 = vadd.s32 104, %v1701_v25 }
 0x12a   : > { %v467_v3 = vpop.f32.mrf.mxu0 }
 0x12b   : > { %v591_v10 = vpack.c.bf16 %v467_v3, %v463_v0  ;;  %v616_v0 = vadd.s32 112, %v1701_v25  ;;  %vm633_vm14 = vcmp.ge.s32.totalorder %v615_v1, %v1704_v27 }
 0x12c   : > { %v471_v4 = vpop.f32.mrf.mxu0  ;;  %v649_v14 = vsel %vm633_vm14, 0.0, %v1490_v20 }
 0x12d   : > { %vm634_vm13 = vcmp.ge.s32.totalorder %v616_v0, %v1704_v27 }
 0x12e   : > { %v473_v5 = vpop.f32.mrf.mxu0 }
 0x130   : > { %v475_v6 = vpop.f32.mrf.mxu0 }
 0x131   : > { %v584_v7 = vpack.c.bf16 %v475_v6, %v471_v4 }
 0x132   : > { %v477_v8 = vpop.f32.mrf.mxu0 }
 0x133   : > { %v592_v9 = vpack.c.bf16 %v477_v8, %v473_v5  ;;  %v647_v5 = vsel %vm631_vm11, 0.0, %v1490_v20  ;;  %v617_v8 = vadd.s32 120, %v1701_v25 }
 0x135   : > { %1216 = vmatprep.subr.bf16.mxu0 %v592_v9  ;;  %vm635_vm15 = vcmp.ge.s32.totalorder %v617_v8, %v1704_v27 }
 0x136   : > { %1217 = vmatpush3.bf16.xpose.msra.mxu0 %v592_v9 }
 0x137   : > { %1218 = vmatprep.subr.bf16.mxu0 %v591_v10 }
 0x13e   : > { %1219 = vmatpush3.bf16.xpose.msra.mxu0 %v591_v10 }
 0x13f   : > { %1220 = vmatprep.subr.bf16.mxu0 %v590_v11 }
 0x146   : > { %1221 = vmatpush3.bf16.xpose.msra.mxu0 %v590_v11 }
 0x147   : > { %1222 = vmatprep.subr.bf16.mxu0 %v589_v12 }
 0x14e   : > { %1223 = vmatpush3.bf16.xpose.msra.mxu0 %v589_v12  ;;  %v650_v12 = vsel %vm634_vm13, 0.0, %v1490_v20 }
 0x14f   : > { %1224 = vmatprep.subr.bf16.mxu0 %v588_v13 }
 0x156   : > { %1225 = vmatpush3.bf16.xpose.msra.mxu0 %v588_v13 }
 0x157   : > { %1226 = vmatprep.subr.bf16.mxu0 %v587_v42 }
 0x15e   : > { %1227 = vmatpush3.bf16.xpose.msra.mxu0 %v587_v42  ;;  %v610_v42 = vadd.s32 64, %v1701_v25 }
 0x15f   : > { %1228 = vmatprep.subr.bf16.mxu0 %v1649_v36 }
 0x160   : > { %vm628_vm8 = vcmp.ge.s32.totalorder %v610_v42, %v1704_v27 }
 0x166   : > { %1229 = vmatpush3.bf16.xpose.msra.mxu0 %v1649_v36  ;;  %v607_v36 = vadd.s32 40, %v1701_v25 }
 0x167   : > { %1230 = vmatprep.subr.bf16.mxu0 %v1641_v30 }
 0x168   : > { %vm625_vm6 = vcmp.ge.s32.totalorder %v607_v36, %v1704_v27 }
 0x169   : > { %v641_v47 = vsel %vm625_vm6, 0.0, %v1490_v20 }
 0x16e   : > { %1231 = vmatpush3.bf16.xpose.msra.mxu0 %v1641_v30  ;;  %v639_v30 = vsel %vm623_vm2, 0.0, %v1490_v20 }
 0x175   : > { %1233 = vmatmul.mubr.bf16.vlgmr.msra.gmra.mxu0 %v578_v34 }
 0x176   : > { %1236 = vmatprep.mubr.bf16.mxu0 %v579_v40  ;;  %v640_v40 = vsel %vm624_vm4, 0.0, %v1490_v20 }
 0x17d   : > { %1237 = vmatmul.mubr.bf16.gmra.mxu0 %v580_v48  ;;  %v612_v48 = vadd.s32 80, %v1701_v25  ;;  %v651_v25 = vsel %vm635_vm15, 0.0, %v1490_v20 }
 0x17e   : > { %1240 = vmatprep.mubr.bf16.mxu0 %v581_v55  ;;  %v644_v55 = vsel %vm628_vm8, 0.0, %v1490_v20 }
 0x17f   : > { %vm630_vm9 = vcmp.ge.s32.totalorder %v612_v48, %v1704_v27  ;;  %v1202_v27 = vpop.f32.mrf.mxu1 }
 0x181   : > { %v514_v18 = vpop.f32.mrf.mxu1 }
 0x183   : > { %v1203_v19 = vpop.f32.mrf.mxu1 }
 0x185   : > { %1241 = vmatmul.mubr.bf16.gmra.mxu0 %v582_v61  ;;  %v646_v61 = vsel %vm630_vm9, 0.0, %v1490_v20 }
 0x186   : > { %1244 = vmatprep.mubr.bf16.mxu0 %v583_v2 }
 0x18d   : > { %1245 = vmatmul.mubr.bf16.gmra.mxu0 %v584_v7  ;;  %v648_v7 = vsel %vm632_vm12, 0.0, %v1490_v20 }
 0x235   : > { %v1234_v22 = vpop.f32.mrf.mxu0 }
 0x236   : > { %v1714_v24 = vadd.f32 %v1234_v22, %v638_v21  ;;  %v517_v21 = vpop.f32.mrf.mxu1 }
 0x237   : > { %v686_v29 = vpop.f32.mrf.mxu0  ;;  %v593_v48 = vpack.c.bf16 %v517_v21, %v514_v18 }
 0x238   : > { %v1719_v31 = vadd.f32 %v686_v29, %v636_v23  ;;  %753 = vmax.xlane.f32.xlu1 %v1714_v24  ;;  %v1206_v22 = vpop.f32.mrf.mxu1 }
 0x239   : > { %v1235_v32 = vpop.f32.mrf.mxu0 }
 0x23a   : > { %v1723_v34 = vadd.f32 %v1235_v32, %v639_v30  ;;  %749 = vmax.xlane.f32.xlu0 %v1719_v31  ;;  %v530_v23 = vpop.f32.mrf.mxu1 }
 0x23b   : > { %v689_v37 = vpop.f32.mrf.mxu0 }
 0x23c   : > { %v1729_v38 = vadd.f32 %v689_v37, %v637_v33  ;;  %755 = vmax.xlane.f32.xlu1 %v1723_v34  ;;  %v1207_v28 = vpop.f32.mrf.mxu1 }
 0x23d   : > { %v1238_v39 = vpop.f32.mrf.mxu0 }
 0x23e   : > { %751 = vmax.xlane.f32.xlu0 %v1729_v38  ;;  %v1747_v51 = vadd.f32 %v1238_v39, %v642_v45  ;;  %v533_v29 = vpop.f32.mrf.mxu1  ;;  %v596_v45 = vpack.c.bf16 %v1207_v28, %v1206_v22 }
 0x23f   : > { %v702_v43 = vpop.f32.mrf.mxu0 }
 0x240   : > { %v1738_v44 = vadd.f32 %v702_v43, %v640_v40  ;;  %v1210_v30 = vpop.f32.mrf.mxu1 }
 0x241   : > { %v1239_v46 = vpop.f32.mrf.mxu0 }
 0x242   : > { %757 = vmax.xlane.f32.xlu0 %v1738_v44  ;;  %v1759_v59 = vadd.f32 %v1239_v46, %v643_v53  ;;  %v546_v32 = vpop.f32.mrf.mxu1  ;;  %v595_v46 = vpack.c.bf16 %v533_v29, %v530_v23 }
 0x243   : > { %v705_v50 = vpop.f32.mrf.mxu0 }
 0x244   : > { %v1749_v52 = vadd.f32 %v705_v50, %v641_v47  ;;  %v1211_v33 = vpop.f32.mrf.mxu1  ;;  %v594_v47 = vpack.c.bf16 %v1203_v19, %v1202_v27 }
 0x245   : > { %v1242_v54 = vpop.f32.mrf.mxu0  ;;  %v598_v42 = vpack.c.bf16 %v1211_v33, %v1210_v30 }
 0x246   : > { %759 = vmax.xlane.f32.xlu1 %v1749_v52  ;;  %761 = vmax.xlane.f32.xlu0 %v1747_v51  ;;  %v1771_v3 = vadd.f32 %v1242_v54, %v646_v61  ;;  %v549_v20 = vpop.f32.mrf.mxu1 }
 0x247   : > { %v718_v58 = vpop.f32.mrf.mxu0  ;;  %v597_v43 = vpack.c.bf16 %v549_v20, %v546_v32 }
 0x248   : > { %v1761_v60 = vadd.f32 %v718_v58, %v644_v55  ;;  %v1214_v35 = vpop.f32.mrf.mxu1 }
 0x249   : > { %v1243_v62 = vpop.f32.mrf.mxu0 }
 0x24a   : > { %763 = vmax.xlane.f32.xlu1 %v1759_v59  ;;  %765 = vmax.xlane.f32.xlu0 %v1761_v60  ;;  %v1782_v10 = vadd.f32 %v1243_v62, %v647_v5  ;;  %v562_v36 = vpop.f32.mrf.mxu1 }
 0x24b   : > { %v721_v2 = vpop.f32.mrf.mxu0 }
 0x24c   : > { %v1773_v4 = vadd.f32 %v721_v2, %v645_v63  ;;  %v1215_v37 = vpop.f32.mrf.mxu1 }
 0x24d   : > { %v1246_v6 = vpop.f32.mrf.mxu0  ;;  %v600_v39 = vpack.c.bf16 %v1215_v37, %v1214_v35 }
 0x24e   : > { %767 = vmax.xlane.f32.xlu1 %v1773_v4  ;;  %769 = vmax.xlane.f32.xlu0 %v1771_v3  ;;  %v1791_v16 = vadd.f32 %v1246_v6, %v650_v12  ;;  %v565_v40 = vpop.f32.mrf.mxu1 }
 0x24f   : > { %v734_v9 = vpop.f32.mrf.mxu0  ;;  %1248 = vmatprep.subr.bf16.mxu1 %v600_v39  ;;  %v599_v41 = vpack.c.bf16 %v565_v40, %v562_v36 }
 0x250   : > { %v1784_v11 = vadd.f32 %v734_v9, %v648_v7  ;;  %1249 = vmatpush3.bf16.msra.mxu1 %v600_v39 }
 0x251   : > { %v1247_v13 = vpop.f32.mrf.mxu0  ;;  %1250 = vmatprep.subr.bf16.mxu1 %v599_v41 }
 0x252   : > { %771 = vmax.xlane.f32.xlu1 %v1782_v10  ;;  %773 = vmax.xlane.f32.xlu0 %v1784_v11  ;;  %v1798_v26 = vadd.f32 %v1247_v13, %v651_v25 }
 0x253   : > { %v737_v15 = vpop.f32.mrf.mxu0 }
 0x254   : > { %v1793_v17 = vadd.f32 %v737_v15, %v649_v14  ;;  %1251 = vmatpush3.bf16.msra.mxu1 %v599_v41 }
 0x255   : > { %1252 = vmatprep.subr.bf16.mxu1 %v598_v42 }
 0x256   : > { %775 = vmax.xlane.f32.xlu1 %v1793_v17  ;;  %777 = vmax.xlane.f32.xlu0 %v1791_v16 }
 0x258   : > { %1253 = vmatpush3.bf16.msra.mxu1 %v598_v42 }
 0x259   : > { %1254 = vmatprep.subr.bf16.mxu1 %v597_v43 }
 0x25a   : > { %779 = vmax.xlane.f32.xlu1 %v1798_v26 }
 0x25c   : > { %1255 = vmatpush3.bf16.msra.mxu1 %v597_v43 }
 0x25d   : > { %1256 = vmatprep.subr.bf16.mxu1 %v596_v45 }
 0x260   : > { %1257 = vmatpush3.bf16.msra.mxu1 %v596_v45 }
 0x261   : > { %1258 = vmatprep.subr.bf16.mxu1 %v595_v46 }
 0x264   : > { %1259 = vmatpush3.bf16.msra.mxu1 %v595_v46 }
 0x265   : > { %1260 = vmatprep.subr.bf16.mxu1 %v594_v47 }
 0x268   : > { %1261 = vmatpush3.bf16.msra.mxu1 %v594_v47 }
 0x269   : > { %1262 = vmatprep.subr.bf16.mxu1 %v593_v48 }
 0x26c   : > { %1263 = vmatpush3.bf16.msra.mxu1 %v593_v48 }
 0x2c1   : > { %v754_v49 = vpop.xlane.xlu1 %753 }
 0x2c2   : > { %v783_v50 = vsub.f32 %v1714_v24, %v754_v49 }
 0x2c3   : > { %v750_v53 = vpop.xlane.xlu0 %749 }
 0x2c4   : > { %v781_v54 = vsub.f32 %v1719_v31, %v750_v53  ;;  %v801_v57 = vmul.f32 1.442695, %v783_v50 }
 0x2c5   : > { %v756_v55 = vpop.xlane.xlu1 %755 }
 0x2c6   : > { %v797_v56 = vmul.f32 1.442695, %v781_v54  ;;  %v784_v58 = vsub.f32 %v1723_v34, %v756_v55 }
 0x2c7   : > { %v752_v61 = vpop.xlane.xlu0 %751 }
 0x2c8   : > { %1363 = vpow2.f32 %v797_v56  ;;  %v782_v62 = vsub.f32 %v1729_v38, %v752_v61  ;;  %v803_v0 = vmul.f32 1.442695, %v784_v58 }
 0x2c9   : > { %1365 = vpow2.f32 %v801_v57 }
 0x2ca   : > { %v799_v63 = vmul.f32 1.442695, %v782_v62 }
 0x2cb   : > { %v758_v1 = vpop.xlane.xlu0 %757 }
 0x2cc   : > { %1367 = vpow2.f32 %v799_v63  ;;  %v785_v2 = vsub.f32 %v1738_v44, %v758_v1 }
 0x2cd   : > { %1369 = vpow2.f32 %v803_v0 }
 0x2ce   : > { %v805_v24 = vmul.f32 1.442695, %v785_v2 }
 0x2cf   : > { %v760_v5 = vpop.xlane.xlu1 %759  ;;  %v762_v31 = vpop.xlane.xlu0 %761 }
 0x2d0   : > { %1371 = vpow2.f32 %v805_v24  ;;  %v786_v6 = vsub.f32 %v1749_v52, %v760_v5  ;;  %v787_v34 = vsub.f32 %v1747_v51, %v762_v31 }
 0x2d2   : > { %v807_v7 = vmul.f32 1.442695, %v786_v6  ;;  %v809_v8 = vmul.f32 1.442695, %v787_v34 }
 0x2d3   : > { %v764_v9 = vpop.xlane.xlu1 %763  ;;  %v766_v38 = vpop.xlane.xlu0 %765 }
 0x2d4   : > { %1373 = vpow2.f32 %v807_v7  ;;  %v788_v12 = vsub.f32 %v1759_v59, %v764_v9  ;;  %v789_v13 = vsub.f32 %v1761_v60, %v766_v38 }
 0x2d5   : > { %v1810_v14 = vpop.eup %1363  ;;  %1375 = vpow2.f32 %v809_v8 }
 0x2d6   : > { %v811_v44 = vmul.f32 1.442695, %v788_v12  ;;  %v813_v15 = vmul.f32 1.442695, %v789_v13  ;;  %829 = vadd.xlane.f32.xlu0 %v1810_v14  ;;  %v1813_v27 = vpop.eup %1365 }
 0x2d7   : > { %v768_v25 = vpop.xlane.xlu1 %767  ;;  %v770_v52 = vpop.xlane.xlu0 %769 }
 0x2d8   : > { %1377 = vpow2.f32 %v811_v44  ;;  %v790_v51 = vsub.f32 %v1773_v4, %v768_v25  ;;  %v791_v18 = vsub.f32 %v1771_v3, %v770_v52 }
 0x2d9   : > { %v1817_v19 = vpop.eup %1367  ;;  %1379 = vpow2.f32 %v813_v15 }
 0x2da   : > { %v815_v59 = vmul.f32 1.442695, %v790_v51  ;;  %v817_v60 = vmul.f32 1.442695, %v791_v18  ;;  %833 = vadd.xlane.f32.xlu0 %v1813_v27  ;;  %831 = vadd.xlane.f32.xlu1 %v1817_v19  ;;  %v1821_v23 = vpop.eup %1369 }
 0x2db   : > { %v772_v21 = vpop.xlane.xlu1 %771  ;;  %v774_v22 = vpop.xlane.xlu0 %773 }
 0x2dc   : > { %1381 = vpow2.f32 %v815_v59  ;;  %v792_v28 = vsub.f32 %v1782_v10, %v772_v21  ;;  %v793_v4 = vsub.f32 %v1784_v11, %v774_v22 }
 0x2dd   : > { %v1825_v29 = vpop.eup %1371  ;;  %1383 = vpow2.f32 %v817_v60 }
 0x2de   : > { %v819_v3 = vmul.f32 1.442695, %v792_v28  ;;  %v821_v30 = vmul.f32 1.442695, %v793_v4  ;;  %835 = vadd.xlane.f32.xlu1 %v1821_v23  ;;  %837 = vadd.xlane.f32.xlu0 %v1825_v29 }
 0x2df   : > { %v776_v32 = vpop.xlane.xlu1 %775  ;;  %v778_v33 = vpop.xlane.xlu0 %777 }
 0x2e0   : > { %1385 = vpow2.f32 %v819_v3  ;;  %v794_v20 = vsub.f32 %v1793_v17, %v776_v32  ;;  %v795_v35 = vsub.f32 %v1791_v16, %v778_v33 }
 0x2e1   : > { %v1831_v36 = vpop.eup %1373  ;;  %1387 = vpow2.f32 %v821_v30 }
 0x2e2   : > { %v1833_v10 = vpop.eup %1375  ;;  %v823_v11 = vmul.f32 1.442695, %v794_v20  ;;  %v825_v37 = vmul.f32 1.442695, %v795_v35  ;;  %839 = vadd.xlane.f32.xlu1 %v1831_v36 }
 0x2e3   : > { %841 = vadd.xlane.f32.xlu0 %v1833_v10  ;;  %v780_v39 = vpop.xlane.xlu1 %779 }
 0x2e4   : > { %1389 = vpow2.f32 %v823_v11  ;;  %v796_v40 = vsub.f32 %v1798_v26, %v780_v39 }
 0x2e5   : > { %v1838_v41 = vpop.eup %1377  ;;  %1391 = vpow2.f32 %v825_v37 }
 0x2e6   : > { %v1840_v17 = vpop.eup %1379  ;;  %v827_v16 = vmul.f32 1.442695, %v796_v40  ;;  %843 = vadd.xlane.f32.xlu1 %v1838_v41 }
 0x2e7   : > { %845 = vadd.xlane.f32.xlu0 %v1840_v17 }
 0x2e8   : > { %1393 = vpow2.f32 %v827_v16 }
 0x2e9   : > { %v1844_v42 = vpop.eup %1381 }
 0x2ea   : > { %v1846_v43 = vpop.eup %1383  ;;  %847 = vadd.xlane.f32.xlu1 %v1844_v42 }
 0x2eb   : > { %849 = vadd.xlane.f32.xlu0 %v1846_v43 }
 0x2ed   : > { %v1850_v26 = vpop.eup %1385 }
 0x2ee   : > { %v1852_v45 = vpop.eup %1387  ;;  %851 = vadd.xlane.f32.xlu1 %v1850_v26 }
 0x2ef   : > { %853 = vadd.xlane.f32.xlu0 %v1852_v45 }
 0x2f1   : > { %v1856_v46 = vpop.eup %1389 }
 0x2f2   : > { %v1858_v47 = vpop.eup %1391  ;;  %855 = vadd.xlane.f32.xlu1 %v1856_v46 }
 0x2f3   : > { %857 = vadd.xlane.f32.xlu0 %v1858_v47 }
 0x2f5   : > { %v1862_v48 = vpop.eup %1393 }
 0x2f6   : > { %859 = vadd.xlane.f32.xlu1 %v1862_v48 }
 0x35f   : > { %v830_v49 = vpop.xlane.xlu0 %829 }
 0x360   : > { %1395 = vrcp.f32 %v830_v49 }
 0x363   : > { %v832_v50 = vpop.xlane.xlu1 %831  ;;  %v834_v53 = vpop.xlane.xlu0 %833 }
 0x364   : > { %1397 = vrcp.f32 %v832_v50 }
 0x365   : > { %1399 = vrcp.f32 %v834_v53 }
 0x367   : > { %v836_v54 = vpop.xlane.xlu1 %835  ;;  %v838_v55 = vpop.xlane.xlu0 %837 }
 0x368   : > { %1401 = vrcp.f32 %v836_v54 }
 0x369   : > { %1403 = vrcp.f32 %v838_v55 }
 0x36b   : > { %v840_v56 = vpop.xlane.xlu1 %839 }
 0x36c   : > { %1405 = vrcp.f32 %v840_v56  ;;  %v842_v57 = vpop.xlane.xlu0 %841 }
 0x36d   : > { %1407 = vrcp.f32 %v842_v57  ;;  %v1396_v58 = vpop.eup %1395 }
 0x36e   : > { %v877_v0 = vmul.f32 %v1396_v58, %v1810_v14 }
 0x36f   : > { %v844_v61 = vpop.xlane.xlu1 %843 }
 0x370   : > { %1409 = vrcp.f32 %v844_v61  ;;  %v846_v62 = vpop.xlane.xlu0 %845 }
 0x371   : > { %v1398_v63 = vpop.eup %1397  ;;  %1411 = vrcp.f32 %v846_v62 }
 0x372   : > { %v878_v1 = vmul.f32 %v1398_v63, %v1817_v19  ;;  %v1400_v2 = vpop.eup %1399 }
 0x373   : > { %v848_v24 = vpop.xlane.xlu1 %847  ;;  %v879_v34 = vmul.f32 %v1400_v2, %v1813_v27 }
 0x374   : > { %1413 = vrcp.f32 %v848_v24  ;;  %v850_v5 = vpop.xlane.xlu0 %849  ;;  %v893_v31 = vpack.c.bf16 %v878_v1, %v877_v0 }
 0x375   : > { %v1402_v6 = vpop.eup %1401  ;;  %1415 = vrcp.f32 %v850_v5 }
 0x376   : > { %1264 = vmatprep.mubr.bf16.mxu1 %v893_v31  ;;  %v880_v7 = vmul.f32 %v1402_v6, %v1821_v23  ;;  %v1404_v8 = vpop.eup %1403 }
 0x377   : > { %v852_v9 = vpop.xlane.xlu1 %851  ;;  %v881_v14 = vmul.f32 %v1404_v8, %v1825_v29 }
 0x378   : > { %1417 = vrcp.f32 %v852_v9  ;;  %v854_v38 = vpop.xlane.xlu0 %853  ;;  %v894_v12 = vpack.c.bf16 %v880_v7, %v879_v34 }
 0x379   : > { %v1406_v13 = vpop.eup %1405  ;;  %1419 = vrcp.f32 %v854_v38 }
 0x37a   : > { %1265 = vmatmul.mubr.bf16.vlgmr.msra.gmra.mxu1 %v894_v12  ;;  %v882_v44 = vmul.f32 %v1406_v13, %v1831_v36  ;;  %v1408_v15 = vpop.eup %1407 }
 0x37b   : > { %v856_v25 = vpop.xlane.xlu1 %855  ;;  %v883_v18 = vmul.f32 %v1408_v15, %v1833_v10 }
 0x37c   : > { %1421 = vrcp.f32 %v856_v25  ;;  %v858_v52 = vpop.xlane.xlu0 %857  ;;  %v895_v51 = vpack.c.bf16 %v882_v44, %v881_v14 }
 0x37d   : > { %v1410_v27 = vpop.eup %1409  ;;  %1423 = vrcp.f32 %v858_v52 }
 0x37e   : > { %1268 = vmatprep.mubr.bf16.mxu1 %v895_v51  ;;  %v884_v19 = vmul.f32 %v1410_v27, %v1838_v41  ;;  %v1412_v59 = vpop.eup %1411 }
 0x37f   : > { %v860_v60 = vpop.xlane.xlu1 %859  ;;  %v885_v23 = vmul.f32 %v1412_v59, %v1840_v17 }
 0x380   : > { %1425 = vrcp.f32 %v860_v60  ;;  %v896_v21 = vpack.c.bf16 %v884_v19, %v883_v18 }
 0x381   : > { %v1414_v22 = vpop.eup %1413 }
 0x382   : > { %1269 = vmatmul.mubr.bf16.gmra.mxu1 %v896_v21  ;;  %v886_v28 = vmul.f32 %v1414_v22, %v1844_v42  ;;  %v1416_v4 = vpop.eup %1415 }
 0x383   : > { %v887_v30 = vmul.f32 %v1416_v4, %v1846_v43 }
 0x384   : > { %v897_v29 = vpack.c.bf16 %v886_v28, %v885_v23 }
 0x385   : > { %v1418_v3 = vpop.eup %1417 }
 0x386   : > { %1272 = vmatprep.mubr.bf16.mxu1 %v897_v29  ;;  %v888_v32 = vmul.f32 %v1418_v3, %v1850_v26  ;;  %v1420_v33 = vpop.eup %1419 }
 0x387   : > { %v889_v36 = vmul.f32 %v1420_v33, %v1852_v45 }
 0x388   : > { %v898_v20 = vpack.c.bf16 %v888_v32, %v887_v30 }
 0x389   : > { %v1422_v35 = vpop.eup %1421 }
 0x38a   : > { %1273 = vmatmul.mubr.bf16.gmra.mxu1 %v898_v20  ;;  %v890_v10 = vmul.f32 %v1422_v35, %v1856_v46  ;;  %v1424_v11 = vpop.eup %1423 }
 0x38b   : > { %v891_v40 = vmul.f32 %v1424_v11, %v1858_v47 }
 0x38c   : > { %v899_v37 = vpack.c.bf16 %v890_v10, %v889_v36 }
 0x38d   : > { %v1426_v39 = vpop.eup %1425 }
 0x38e   : > { %1276 = vmatprep.mubr.bf16.mxu1 %v899_v37  ;;  %v892_v41 = vmul.f32 %v1426_v39, %v1862_v48 }
 0x390   : > { %v900_v17 = vpack.c.bf16 %v892_v41, %v891_v40 }
 0x392   : > { %1277 = vmatmul.mubr.bf16.gmra.mxu1 %v900_v17 }
 0x43a   : > { %v1266_v16 = vpop.f32.mrf.mxu1 }
 0x43b   : > { %1000 = vst [vmem:[%s1884_s16 + $0x10] sm:$0xff] %v1266_v16 }
 0x43c   : > { %v935_v42 = vpop.f32.mrf.mxu1 }
 0x43d   : > { %998 = vst [vmem:[%s1884_s16] sm:$0xff] %v935_v42 }
 0x43e   : > { %v1267_v43 = vpop.f32.mrf.mxu1 }
 0x43f   : > { %1001 = vst [vmem:[%s1884_s16 + $0x18] sm:$0xff] %v1267_v43 }
 0x440   : > { %v938_v26 = vpop.f32.mrf.mxu1 }
 0x441   : > { %999 = vst [vmem:[%s1884_s16 + $0x8] sm:$0xff] %v938_v26 }
 0x442   : > { %v1270_v45 = vpop.f32.mrf.mxu1 }
 0x443   : > { %1004 = vst [vmem:[%s1884_s16 + $0x30] sm:$0xff] %v1270_v45 }
 0x444   : > { %v951_v46 = vpop.f32.mrf.mxu1 }
 0x445   : > { %1002 = vst [vmem:[%s1884_s16 + $0x20] sm:$0xff] %v951_v46 }
 0x446   : > { %v1271_v47 = vpop.f32.mrf.mxu1 }
 0x447   : > { %1005 = vst [vmem:[%s1884_s16 + $0x38] sm:$0xff] %v1271_v47 }
 0x448   : > { %v954_v48 = vpop.f32.mrf.mxu1 }
 0x449   : > { %1003 = vst [vmem:[%s1884_s16 + $0x28] sm:$0xff] %v954_v48 }
 0x44a   : > { %v1274_v49 = vpop.f32.mrf.mxu1 }
 0x44b   : > { %1008 = vst [vmem:[%s1884_s16 + $0x50] sm:$0xff] %v1274_v49 }
 0x44c   : > { %v967_v50 = vpop.f32.mrf.mxu1 }
 0x44d   : > { %1006 = vst [vmem:[%s1884_s16 + $0x40] sm:$0xff] %v967_v50 }
 0x44e   : > { %v1275_v53 = vpop.f32.mrf.mxu1 }
 0x44f   : > { %1009 = vst [vmem:[%s1884_s16 + $0x58] sm:$0xff] %v1275_v53 }
 0x450   : > { %v970_v54 = vpop.f32.mrf.mxu1 }
 0x451   : > { %1007 = vst [vmem:[%s1884_s16 + $0x48] sm:$0xff] %v970_v54 }
 0x452   : > { %v1278_v55 = vpop.f32.mrf.mxu1 }
 0x453   : > { %1012 = vst [vmem:[%s1884_s16 + $0x70] sm:$0xff] %v1278_v55 }
 0x454   : > { %v983_v56 = vpop.f32.mrf.mxu1 }
 0x455   : > { %1010 = vst [vmem:[%s1884_s16 + $0x60] sm:$0xff] %v983_v56 }
 0x456   : > { %v1279_v57 = vpop.f32.mrf.mxu1 }
 0x457   : > { %1013 = vst [vmem:[%s1884_s16 + $0x78] sm:$0xff] %v1279_v57 }
 0x458   : > { %v986_v58 = vpop.f32.mrf.mxu1 }
 0x459   : > { %1011 = vst [vmem:[%s1884_s16 + $0x68] sm:$0xff] %v986_v58 }
 0x45a   : > { %1440 = shalt.err (!%p1437_p3)
}
 0x45b   : > { %s1441_s29 = scalar_lea.hbm %s1905_s24, 2048  ;;  %s1445_s4 = scalar_lea.hbm %s1955_s2, 4096 }
 0x45c   : > { %p1442_p4 = scmp.ne.s32.totalorder %s1905_s24, %s1441_s29  ;;  %p1446_p9 = scmp.lt.s32.totalorder %s1905_s24, %s1955_s2 }
 0x45d   : > { %p1447_p10 = scmp.lt.s32.totalorder %s1445_s4, %s1441_s29 }
 0x45e   : > { %p1443_p7 = pnand %p1442_p4, %p1547_p5 }
 0x45f   : > { %p1448_p11 = por %p1447_p10, %p1446_p9 }
 0x460   : > { %p1444_p8 = pneg %p1443_p7 }
 0x462   : > { %p1449_p12 = pnand %p1448_p11, %p1444_p8 }
 0x464   : > { %1452 = shalt.err (!%p1449_p12)
}
 0x465   : > { %s1492_s7 = smov 128   ;;  %s1493_s8 = smov 8  }
 0x466   : > { %1280 = dma.vmem_to_hbm [thread:$0]  (%p1547_p5), %s1907_s21, 2048, %s1905_s24, %s1913_s25, %s1492_s7, %s1492_s7, %s1493_s8  }
 0x467 PF: > { %p1286_p13 = scmp.ge.s32.totalorder %s1487_s12, 2  ;;  %s1043_s14 = sand.u32 1, %s1475_s9  }
 0x468   : > { %s1044_s16 = scalar_lea.sflag [#allocation3], %s1043_s14 }
 0x469   : > { %p1283_p0 = pnand %p1286_p13, %p1551_p6 }
 0x46b   : > { %p1284_p1 = pneg %p1283_p0 }
 0x46d   : > { %1470 = dma.done.wait (%p1284_p1), %s1044_s16, 2048  }
 0x46e   : > { %1472 = vsyncadd (%p1284_p1), %s1044_s16, 4294965248  ;;  %p12_p2 = scmp.ge.s32.totalorder %s1534_s15, 4   ;;  %s1958_s9 = smov %s1479_s10 }
 0x46f   : > { %s1959_s10 = smov %s1483_s11  ;;  %s1960_s11 = smov %s1545_s18 }
 0x470   : > { %s1961_s12 = smov %s1534_s15  ;;  %14 = sbr.rel (!%p12_p2) target bundleno = 3 (0x3), region = 63 }
 0x475   :  { %1049 = vsyncpa [#allocation3], 1 }
 0x476   :  { %1051 = vsyncpa [#allocation3 + $0x1], 1 }

</bundles_post_ra>
